<compile_context>
chip_gen: v5e
topology: v5e:2x2
jax: 0.10.0
libtpu: 0.0.40
codegen_flags: <defaults>
</compile_context>

<pallas_src>
import functools

import jax
import jax.numpy as jnp
from jax.experimental import pallas as pl
from jax.experimental.pallas import tpu as pltpu

_LANE = 128
_SUBLANE = 8
_TILE_BYTES = 4 << 20  # ~4 MiB per input per grid step (HBM-bandwidth bound)


def _round_up(n, m):
    return ((n + m - 1) // m) * m


def _choose_lanes(n_aligned):
    """Widest lane count dividing n_aligned, preferring shapes with >= 8 rows."""
    candidates = (1024, 512, 256, 128)
    for lanes in candidates:
        if n_aligned % lanes == 0 and n_aligned // lanes >= _SUBLANE:
            return lanes
    for lanes in candidates:
        if n_aligned % lanes == 0:
            return lanes
    raise AssertionError("n_aligned must be a multiple of 128")


def _msle_partial_kernel(x_ref, y_ref, o_ref, *, row_tile, lanes, inner,
                         total_tiles, rem_rows):
    """Accumulate per-(sublane, lane) partial sums of (x - y)^2 into o_ref.

    o_ref is an (8, lanes) f32 block, one per leading ("parallel") grid index;
    it stays resident across the inner ("arbitrary") reduction axis.
    """
    c = pl.program_id(0)          # core/group index ("parallel")
    i = pl.program_id(1)          # tile index within the group ("arbitrary")
    t = c * inner + i             # global row-tile index
    last_t = total_tiles - 1

    @pl.when(i == 0)
    def _():
        o_ref[...] = jnp.zeros_like(o_ref)

    d = x_ref[...].astype(jnp.float32) - y_ref[...].astype(jnp.float32)
    sq = d * d

    def fold_and_accumulate(v):
        # (row_tile, lanes) -> (row_tile//8, 8, lanes) splits the sublane axis
        # on an 8-boundary, so it is layout-aligned; the axis-0 sum is pure
        # VPU vreg adds (no XLU, no relayout copy).
        if row_tile == _SUBLANE:
            o_ref[...] += v
        else:
            o_ref[...] += jnp.sum(
                v.reshape(row_tile // _SUBLANE, _SUBLANE, lanes), axis=0)

    if rem_rows == row_tile:
        # All real tiles are full. Skip only the (at most one) overhanging grid
        # point whose index_map was clamped to the last tile.
        @pl.when(t <= last_t)
        def _():
            fold_and_accumulate(sq)
    else:
        @pl.when(t < last_t)
        def _():
            fold_and_accumulate(sq)

        @pl.when(t == last_t)
        def _():
            # Partial last row-block: rows >= rem_rows are out-of-range reads
            # with unspecified contents; jnp.where forces their contribution
            # to 0 even if the garbage is NaN/Inf. Do not "fix" this.
            row_ids = jax.lax.broadcasted_iota(jnp.int32, (row_tile, lanes), 0)
            fold_and_accumulate(jnp.where(row_ids < rem_rows, sq, 0.0))


def msle_loss(x, y):
    """log(mean((x - y)**2)) — forward of the reference MSLELoss module.

    Note: this is log(MSE). It is -inf when x == y exactly, matching
    torch.log(nn.MSELoss()(x, y)).
    """
    assert x.shape == y.shape, "x and y must have the same shape"
    n_true = x.size

    n_aligned = (n_true // _LANE) * _LANE
    if n_aligned == 0:
        # Fewer than 128 elements: plain JAX is cheaper than a kernel launch.
        d = x.astype(jnp.float32) - y.astype(jnp.float32)
        return jnp.log(jnp.sum(d * d) / jnp.float32(n_true))

    xf = jnp.reshape(x, (-1,))
    yf = jnp.reshape(y, (-1,))

    # Ragged (<128-element) tail handled as a tiny wrapper-side correction so
    # the kernel path never pads / copies the full arrays.
    if n_aligned != n_true:
        # TODO(synk): the prefix slice below may materialize a copy in XLA;
        # acceptable only on this rare (n % 128 != 0) path.
        x_main, y_main = xf[:n_aligned], yf[:n_aligned]
        dt = xf[n_aligned:].astype(jnp.float32) - yf[n_aligned:].astype(jnp.float32)
        tail_sq = jnp.sum(dt * dt)
    else:
        x_main, y_main = xf, yf
        tail_sq = jnp.float32(0.0)

    lanes = _choose_lanes(n_aligned)
    rows = n_aligned // lanes

    # Byte-budget row tile: ~4 MiB per input per grid step in the native dtype.
    itemsize = x.dtype.itemsize
    row_tile = max(_SUBLANE,
                   (_TILE_BYTES // (lanes * itemsize)) // _SUBLANE * _SUBLANE)
    row_tile = min(row_tile, _round_up(rows, _SUBLANE))

    total_tiles = pl.cdiv(rows, row_tile)
    rem_rows = rows - (total_tiles - 1) * row_tile  # valid rows in last tile

    # Leading "parallel" axis: shards the reduction across both TensorCores on
    # v7x; on single-TC v5e/v6e it is just a cheap outer loop split.
    ncores = 2 if total_tiles >= 2 else 1
    inner = pl.cdiv(total_tiles, ncores)
    last_t = total_tiles - 1

    x2 = x_main.reshape(rows, lanes)
    y2 = y_main.reshape(rows, lanes)

    def in_map(c, i):
        # Clamp the (at most one) overhanging grid point to a valid tile; its
        # contribution is skipped inside the kernel.
        return (jnp.minimum(c * inner + i, last_t), 0)

    kernel = functools.partial(
        _msle_partial_kernel, row_tile=row_tile, lanes=lanes, inner=inner,
        total_tiles=total_tiles, rem_rows=rem_rows)

    # 2 inputs x 2 pipeline buffers + accumulator output, with headroom.
    tile_bytes = row_tile * lanes * itemsize
    vmem_limit = int(min(48 << 20, max(32 << 20, 4 * tile_bytes + (4 << 20))))

    partial = pl.pallas_call(
        kernel,
        out_shape=jax.ShapeDtypeStruct((ncores * _SUBLANE, lanes), jnp.float32),
        grid_spec=pltpu.PrefetchScalarGridSpec(
            num_scalar_prefetch=0,
            grid=(ncores, inner),
            in_specs=[
                pl.BlockSpec((row_tile, lanes), in_map),
                pl.BlockSpec((row_tile, lanes), in_map),
            ],
            out_specs=pl.BlockSpec((_SUBLANE, lanes), lambda c, i: (c, 0)),
        ),
        compiler_params=pltpu.CompilerParams(
            dimension_semantics=("parallel", "arbitrary"),
            vmem_limit_bytes=vmem_limit,
        ),
    )(x2, y2)

    total = jnp.sum(partial) + tail_sq
    return jnp.log(total / jnp.float32(n_true))


if __name__ == "__main__":
    key = jax.random.PRNGKey(0)
    kx, ky = jax.random.split(key)
    # Small NCHW inputs consistent with an elementwise loss module.
    x = jax.random.uniform(kx, (2, 4, 16, 16), dtype=jnp.float32) + 0.5
    y = jax.random.uniform(ky, (2, 4, 16, 16), dtype=jnp.float32) + 0.5

    loss = msle_loss(x, y)
    jax.block_until_ready(loss)

    # Reference check in plain JAX (same forward as the torch module).
    ref = jnp.log(jnp.mean((x - y) ** 2))
    assert jnp.allclose(loss, ref, rtol=1e-5, atol=1e-6), (loss, ref)

    print("KERNEL_OK")
</pallas_src>

<mosaic_0001>
module attributes {stable_mosaic.version = 11 : i64} {
  func.func @_msle_partial_kernel(%arg0: i32, %arg1: i32, %arg2: memref<8x256xf32, #tpu.memory_space<vmem>>, %arg3: memref<8x256xf32, #tpu.memory_space<vmem>>, %arg4: memref<8x256xf32, #tpu.memory_space<vmem>>) attributes {dimension_semantics = [#tpu.dimension_semantics<parallel>, #tpu.dimension_semantics<arbitrary>], iteration_bounds = array<i64: 1, 1>, scalar_prefetch = 0 : i64, scratch_operands = 0 : i64, tpu.core_type = #tpu.core_type<tc>, window_params = [{transform_indices = @transform_0, window_bounds = array<i64: 8, 256>}, {transform_indices = @transform_1, window_bounds = array<i64: 8, 256>}, {transform_indices = @transform_2, window_bounds = array<i64: 8, 256>}]} {
    %c1_i32 = arith.constant 1 : i32
    %0 = arith.muli %arg0, %c1_i32 : i32
    %1 = arith.addi %0, %arg1 : i32
    %c0_i32 = arith.constant 0 : i32
    %2 = arith.cmpi eq, %arg1, %c0_i32 : i32
    %3 = arith.extui %2 : i1 to i32
    %c0_i32_0 = arith.constant 0 : i32
    %4 = arith.cmpi ne, %3, %c0_i32_0 : i32
    scf.if %4 {
      %cst = arith.constant 0.000000e+00 : f32
      %12 = vector.broadcast %cst : f32 to vector<8x256xf32>
      %c0_6 = arith.constant 0 : index
      %c0_7 = arith.constant 0 : index
      %13 = vector.load %arg4[%c0_6, %c0_7] : memref<8x256xf32, #tpu.memory_space<vmem>>, vector<8x256xf32>
      tpu.vector_store %arg4[%c0_6, %c0_7], %12 {strides = array<i32>} : memref<8x256xf32, #tpu.memory_space<vmem>>, vector<8x256xf32>,
    } else {
    }
    %c0 = arith.constant 0 : index
    %c0_1 = arith.constant 0 : index
    %5 = vector.load %arg2[%c0, %c0_1] : memref<8x256xf32, #tpu.memory_space<vmem>>, vector<8x256xf32>
    %c0_2 = arith.constant 0 : index
    %c0_3 = arith.constant 0 : index
    %6 = vector.load %arg3[%c0_2, %c0_3] : memref<8x256xf32, #tpu.memory_space<vmem>>, vector<8x256xf32>
    %7 = arith.subf %5, %6 : vector<8x256xf32>
    %8 = arith.mulf %7, %7 : vector<8x256xf32>
    %c0_i32_4 = arith.constant 0 : i32
    %9 = arith.cmpi sle, %1, %c0_i32_4 : i32
    %10 = arith.extui %9 : i1 to i32
    %c0_i32_5 = arith.constant 0 : i32
    %11 = arith.cmpi ne, %10, %c0_i32_5 : i32
    scf.if %11 {
      %c0_6 = arith.constant 0 : index
      %c0_7 = arith.constant 0 : index
      %12 = vector.load %arg4[%c0_6, %c0_7] : memref<8x256xf32, #tpu.memory_space<vmem>>, vector<8x256xf32>
      %13 = arith.addf %12, %8 : vector<8x256xf32>
      %c0_8 = arith.constant 0 : index
      %c0_9 = arith.constant 0 : index
      %14 = vector.load %arg4[%c0_8, %c0_9] : memref<8x256xf32, #tpu.memory_space<vmem>>, vector<8x256xf32>
      tpu.vector_store %arg4[%c0_8, %c0_9], %13 {strides = array<i32>} : memref<8x256xf32, #tpu.memory_space<vmem>>, vector<8x256xf32>,
    } else {
    }
    return
  }
  func.func @transform_0(%arg0: i32, %arg1: i32) -> (i32, i32) {
    %c1_i32 = arith.constant 1 : i32
    %0 = arith.muli %arg0, %c1_i32 : i32
    %1 = arith.addi %0, %arg1 : i32
    %c0_i32 = arith.constant 0 : i32
    %2 = arith.minsi %1, %c0_i32 : i32
    %c0_i32_0 = arith.constant 0 : i32
    %c0_i32_1 = arith.constant 0 : i32
    return %2, %c0_i32_0 : i32, i32
  }
  func.func @transform_1(%arg0: i32, %arg1: i32) -> (i32, i32) {
    %c1_i32 = arith.constant 1 : i32
    %0 = arith.muli %arg0, %c1_i32 : i32
    %1 = arith.addi %0, %arg1 : i32
    %c0_i32 = arith.constant 0 : i32
    %2 = arith.minsi %1, %c0_i32 : i32
    %c0_i32_0 = arith.constant 0 : i32
    %c0_i32_1 = arith.constant 0 : i32
    return %2, %c0_i32_0 : i32, i32
  }
  func.func @transform_2(%arg0: i32, %arg1: i32) -> (i32, i32) {
    %c0_i32 = arith.constant 0 : i32
    %c0_i32_0 = arith.constant 0 : i32
    return %arg0, %c0_i32 : i32, i32
  }
}

</mosaic_0001>

<bundles_post_ra>
// kernel: tpu_custom_call.1
= control target key start
LH: loop header
LB: loop body
LE: loop exit
PB: predicated region body
PF: predicated region fallthrough
CT: control target
= control target key end

     0   :  { %7 = vsyncpa [#allocation3], 0  ;;  %s214_s0 = inlined_call_operand.hbm [shape: f32[8,256], index: 0, kind: input, shape index: {}]   ;;  %s215_s1 = inlined_call_operand.hbm [shape: f32[8,256], index: 1, kind: input, shape index: {}]   ;;  %s216_s2 = inlined_call_operand.hbm [shape: f32[8,256], index: 2, kind: output, shape index: {}]  }
   0x1   :  { %8 = vsyncpa [#allocation6], 0 }
   0x2   :  { %9 = vsyncpa [#allocation4], 0  ;;  %s21_s11 = sshll.u32 %s214_s0, 4  ;;  %s187_s12 = smov [#allocation2]   ;;  %s22_s11 = int_to_ptr.hbm [resolvable:$true] %s21_s11 }
   0x3   :  { %s23_s13 = sshll.u32 %s187_s12, 4  ;;  %s38_s16 = sshll.u32 %s215_s1, 4  ;;  %s24_s13 = int_to_ptr.vmem [resolvable:$true] %s23_s13  ;;  %s39_s16 = int_to_ptr.hbm [resolvable:$true] %s38_s16 }
   0x4   :  { %26 = dma.hbm_to_vmem [thread:$0]  %s22_s11, 256, %s24_s13, [#allocation3]  }
   0x5   :  { %s188_s17 = smov [#allocation5]  }
   0x6   :  { %s40_s18 = sshll.u32 %s188_s17, 4  ;;  %s41_s18 = int_to_ptr.vmem [resolvable:$true] %s40_s18 }
   0x7   :  { %43 = dma.hbm_to_vmem [thread:$0]  %s39_s16, 256, %s41_s18, [#allocation6]  }
   0x8   :  { %181 = dma.done.wait [#allocation3], 256  }
   0x9   :  { %182 = vsyncadd [#allocation3], 4294967040 }
   0xa   :  { %183 = dma.done.wait [#allocation6], 256  }
   0xb   :  { %184 = vsyncadd [#allocation6], 4294967040  ;;  %v65_v0 = vld [vmem:[#allocation2] sm:$0xff]  ;;  %v67_v1 = vld [vmem:[#allocation5] sm:$0xff]  ;;  %s189_s0 = smov [#allocation7]   ;;  %s90_s21 = sshll.u32 %s216_s2, 4  ;;  %s91_s21 = int_to_ptr.hbm [resolvable:$true] %s90_s21 }
   0xc   :  { %v66_v2 = vld [vmem:[#allocation2 + $0x8] sm:$0xff]  ;;  %v69_v3 = vsub.f32 %v65_v0, %v67_v1  ;;  %v68_v4 = vld [vmem:[#allocation5 + $0x8] sm:$0xff]  ;;  %s88_s19 = sshll.u32 %s189_s0, 4  ;;  %s89_s19 = int_to_ptr.vmem [resolvable:$true] %s88_s19 }
   0xd   :  { %v70_v5 = vsub.f32 %v66_v2, %v68_v4 }
   0xe   :  { %v71_v6 = vmul.f32 %v69_v3, %v69_v3 }
   0xf   :  { %v72_v7 = vmul.f32 %v70_v5, %v70_v5 }
  0x10   :  { %81 = vst [vmem:[#allocation7] sm:$0xff] %v71_v6 }
  0x11   :  { %82 = vst [vmem:[#allocation7 + $0x8] sm:$0xff] %v72_v7 }
  0x12   :  { %93 = dma.vmem_to_hbm [thread:$0]  %s89_s19, 256, %s91_s21, [#allocation4]  }
  0x13   :  { %185 = dma.done.wait [#allocation4], 256  }
  0x14   :  { %186 = vsyncadd [#allocation4], 4294967040 }
  0x15   :  { %98 = vsyncpa [#allocation3], 1 }
  0x16   :  { %99 = vsyncpa [#allocation6], 1 }
  0x17   :  { %100 = vsyncpa [#allocation4], 1 }

</bundles_post_ra>
